<compile_context>
chip_gen: v7x
topology: tpu7x:2x2x1
jax: 0.10.0
libtpu: 0.0.40
codegen_flags: <defaults>
</compile_context>

<pallas_src>
import functools
import math

import jax
import jax.numpy as jnp
from jax.experimental import pallas as pl
from jax.experimental.pallas import tpu as pltpu


def layernorm_kernel(alpha_ref, bias_ref, x_ref, o_ref, *, eps, hidden):
    # x_ref / o_ref: (block_rows, hidden) VMEM tiles; alpha/bias: (1,) SMEM.
    x = x_ref[...].astype(jnp.float32)

    # One-pass statistics (single full-tile traversal): sum(x) and sum(x*x).
    s1 = jnp.sum(x, axis=-1, keepdims=True)
    s2 = jnp.sum(x * x, axis=-1, keepdims=True)
    inv_n = 1.0 / hidden
    mean = s1 * inv_n
    # unbiased variance (ddof=1), matches torch.std default; clamp cancellation.
    var = jnp.maximum(s2 - s1 * mean, 0.0) * (1.0 / (hidden - 1))
    std = jnp.sqrt(var)

    # (block_rows, 1) column math only — exact divide, perf-negligible.
    inv = pl.reciprocal(std + eps, approx=False)
    alpha = alpha_ref[0].astype(jnp.float32)
    bias = bias_ref[0].astype(jnp.float32)
    scale = alpha * inv                 # (block_rows, 1)
    shift = bias - mean * scale         # (block_rows, 1) — folds the subtract

    # Single fused output pass: y = x*scale + shift.
    o_ref[...] = (x * scale + shift).astype(o_ref.dtype)


def _pick_block_rows(rows, hidden, itemsize):
    """Dtype- and VMEM-aware row-tile size.

    Budget = double-buffered input + output tiles (x.dtype) plus ~3 full-tile
    f32 temporaries materialized in-kernel (cast, x*x, output), kept under
    12 MiB so it fits v5e's 16 MiB scoped-VMEM default (and v7x's 32 MiB).
    Also keeps the grid >= 2 (target 8) blocks so the 'parallel' axis can be
    sharded across v7x's two TensorCores.
    """
    VMEM_BUDGET = 12 << 20
    MIN_TILE_BYTES = 512 << 10     # stay near the HBM-roofline plateau
    TARGET_GRID = 8

    per_row_vmem = hidden * (4 * itemsize + 12)
    br = (VMEM_BUDGET // per_row_vmem) // 8 * 8
    if br < 8:
        # TODO(synk): very large hidden — even an 8-row tile busts the VMEM
        # budget; would need a two-pass hidden-split reduction.
        br = 8

    if rows <= 8:
        return rows                # single block == full array dim (allowed)

    # Don't shrink below an 8-row / ~512 KiB input tile (per-step overhead),
    # but aim for >= TARGET_GRID grid steps.
    floor_rows = max(8, (MIN_TILE_BYTES // (hidden * itemsize)) // 8 * 8)
    cap = max(floor_rows, (-(-rows // TARGET_GRID)) // 8 * 8, 8)
    br = min(br, cap)

    # Guarantee at least 2 grid steps when there is more than one tile of work.
    if br >= rows:
        br = max(8, (rows // 2) // 8 * 8)
    return max(8, min(br, rows))


def layer_normalization(x, alpha, bias, eps=1e-6, block_rows=None):
    orig_shape = x.shape
    hidden = orig_shape[-1]
    assert hidden > 1, "unbiased std (ddof=1) requires hidden > 1"
    rows = math.prod(orig_shape[:-1])
    x2 = x.reshape(rows, hidden)

    if block_rows is None:
        block_rows = _pick_block_rows(rows, hidden, jnp.dtype(x.dtype).itemsize)

    # No row padding: the partial final block is handled by Pallas (rows are
    # independent; out-of-extent writes are dropped), saving a full HBM copy.
    grid = (pl.cdiv(rows, block_rows),)

    out = pl.pallas_call(
        functools.partial(layernorm_kernel, eps=eps, hidden=hidden),
        out_shape=jax.ShapeDtypeStruct((rows, hidden), x.dtype),
        grid=grid,
        in_specs=[
            pl.BlockSpec(memory_space=pltpu.SMEM),   # alpha (1,)
            pl.BlockSpec(memory_space=pltpu.SMEM),   # bias  (1,)
            pl.BlockSpec((block_rows, hidden), lambda i: (i, 0)),
        ],
        out_specs=pl.BlockSpec((block_rows, hidden), lambda i: (i, 0)),
        compiler_params=pltpu.CompilerParams(
            dimension_semantics=("parallel",)),
    )(alpha, bias, x2)

    return out.reshape(orig_shape)


def layer_normalization_ref(x, alpha, bias, eps=1e-6):
    xf = x.astype(jnp.float32)
    mean = jnp.mean(xf, axis=-1, keepdims=True)
    std = jnp.std(xf, axis=-1, keepdims=True, ddof=1)
    y = (xf - mean) / (std + eps)
    return (alpha[0] * y + bias[0]).astype(x.dtype)


if __name__ == "__main__":
    key = jax.random.PRNGKey(0)
    batch, seq, hidden = 2, 8, 32
    x = jax.random.normal(key, (batch, seq, hidden), dtype=jnp.float32)

    # deterministic parameter init matching the module: alpha=ones(1), bias=zeros(1)
    alpha = jnp.ones((1,), dtype=jnp.float32)
    bias = jnp.zeros((1,), dtype=jnp.float32)

    out = layer_normalization(x, alpha, bias, eps=1e-6)
    out = jax.block_until_ready(out)

    ref = layer_normalization_ref(x, alpha, bias, eps=1e-6)
    assert out.shape == x.shape and out.dtype == x.dtype
    assert jnp.allclose(out, ref, atol=1e-5, rtol=1e-5), "mismatch vs reference"

    # exercise the partial-final-block path (rows not a multiple of block_rows)
    x_odd = jax.random.normal(jax.random.PRNGKey(1), (3, 5, hidden), jnp.float32)
    out_odd = jax.block_until_ready(layer_normalization(x_odd, alpha, bias))
    ref_odd = layer_normalization_ref(x_odd, alpha, bias)
    assert jnp.allclose(out_odd, ref_odd, atol=1e-5, rtol=1e-5)

    print("KERNEL_OK")
</pallas_src>

<mosaic_0001>
module attributes {stable_mosaic.version = 11 : i64} {
  func.func @layernorm_kernel(%arg0: i32, %arg1: memref<1xf32, #tpu.memory_space<smem>>, %arg2: memref<1xf32, #tpu.memory_space<smem>>, %arg3: memref<8x32xf32, #tpu.memory_space<vmem>>, %arg4: memref<8x32xf32, #tpu.memory_space<vmem>>) attributes {dimension_semantics = [#tpu.dimension_semantics<parallel>], iteration_bounds = array<i64: 2>, scalar_prefetch = 0 : i64, scratch_operands = 0 : i64, tpu.core_type = #tpu.core_type<tc>, window_params = [{transform_indices = @transform_0, window_bounds = array<i64: 1>}, {transform_indices = @transform_1, window_bounds = array<i64: 1>}, {transform_indices = @transform_2, window_bounds = array<i64: 8, 32>}, {transform_indices = @transform_3, window_bounds = array<i64: 8, 32>}]} {
    %c0 = arith.constant 0 : index
    %c0_0 = arith.constant 0 : index
    %0 = vector.load %arg3[%c0, %c0_0] : memref<8x32xf32, #tpu.memory_space<vmem>>, vector<8x32xf32>
    %cst = arith.constant dense<0.000000e+00> : vector<8xf32>
    %1 = vector.multi_reduction <add>, %0, %cst [1] : vector<8x32xf32> to vector<8xf32>
    %2 = vector.shape_cast %1 : vector<8xf32> to vector<8x1xf32>
    %3 = arith.mulf %0, %0 : vector<8x32xf32>
    %cst_1 = arith.constant dense<0.000000e+00> : vector<8xf32>
    %4 = vector.multi_reduction <add>, %3, %cst_1 [1] : vector<8x32xf32> to vector<8xf32>
    %5 = vector.shape_cast %4 : vector<8xf32> to vector<8x1xf32>
    %cst_2 = arith.constant 3.125000e-02 : f32
    %6 = vector.broadcast %cst_2 : f32 to vector<8x1xf32>
    %7 = arith.mulf %2, %6 : vector<8x1xf32>
    %8 = arith.mulf %2, %7 : vector<8x1xf32>
    %9 = arith.subf %5, %8 : vector<8x1xf32>
    %cst_3 = arith.constant 0.000000e+00 : f32
    %10 = vector.broadcast %cst_3 : f32 to vector<8x1xf32>
    %11 = arith.maximumf %9, %10 : vector<8x1xf32>
    %cst_4 = arith.constant 0.0322580636 : f32
    %12 = vector.broadcast %cst_4 : f32 to vector<8x1xf32>
    %13 = arith.mulf %11, %12 : vector<8x1xf32>
    %14 = math.sqrt %13 : vector<8x1xf32>
    %cst_5 = arith.constant 9.99999997E-7 : f32
    %15 = vector.broadcast %cst_5 : f32 to vector<8x1xf32>
    %16 = arith.addf %14, %15 : vector<8x1xf32>
    %17 = tpu.reciprocal %16 : vector<8x1xf32> -> vector<8x1xf32>
    %c0_6 = arith.constant 0 : index
    %18 = memref.load %arg1[%c0_6] : memref<1xf32, #tpu.memory_space<smem>>
    %c0_7 = arith.constant 0 : index
    %19 = memref.load %arg2[%c0_7] : memref<1xf32, #tpu.memory_space<smem>>
    %20 = vector.broadcast %18 : f32 to vector<8x1xf32>
    %21 = arith.mulf %20, %17 : vector<8x1xf32>
    %22 = arith.mulf %7, %21 : vector<8x1xf32>
    %23 = vector.broadcast %19 : f32 to vector<8x1xf32>
    %24 = arith.subf %23, %22 : vector<8x1xf32>
    %25 = vector.broadcast %21 : vector<8x1xf32> to vector<8x32xf32>
    %26 = arith.mulf %0, %25 : vector<8x32xf32>
    %27 = vector.broadcast %24 : vector<8x1xf32> to vector<8x32xf32>
    %28 = arith.addf %26, %27 : vector<8x32xf32>
    %c0_8 = arith.constant 0 : index
    %c0_9 = arith.constant 0 : index
    %29 = vector.load %arg4[%c0_8, %c0_9] : memref<8x32xf32, #tpu.memory_space<vmem>>, vector<8x32xf32>
    tpu.vector_store %arg4[%c0_8, %c0_9], %28 {strides = array<i32>} : memref<8x32xf32, #tpu.memory_space<vmem>>, vector<8x32xf32>,
    return
  }
  func.func @transform_0(%arg0: i32) -> i32 {
    %c0_i32 = arith.constant 0 : i32
    %c0_i32_0 = arith.constant 0 : i32
    return %c0_i32 : i32
  }
  func.func @transform_1(%arg0: i32) -> i32 {
    %c0_i32 = arith.constant 0 : i32
    %c0_i32_0 = arith.constant 0 : i32
    return %c0_i32 : i32
  }
  func.func @transform_2(%arg0: i32) -> (i32, i32) {
    %c0_i32 = arith.constant 0 : i32
    %c0_i32_0 = arith.constant 0 : i32
    return %arg0, %c0_i32 : i32, i32
  }
  func.func @transform_3(%arg0: i32) -> (i32, i32) {
    %c0_i32 = arith.constant 0 : i32
    %c0_i32_0 = arith.constant 0 : i32
    return %arg0, %c0_i32 : i32, i32
  }
}

</mosaic_0001>

<bundles_post_ra>
// kernel: tpu_custom_call.1
= control target key start
LH: loop header
LB: loop body
LE: loop exit
PB: predicated region body
PF: predicated region fallthrough
CT: control target
= control target key end

     0   :  { %s661_s0 = inlined_call_operand.<no memory space> [shape: f32[1], index: 0, kind: input, shape index: {}]   ;;  %s662_s1 = inlined_call_operand.<no memory space> [shape: f32[1], index: 1, kind: input, shape index: {}]   ;;  %s663_s2 = inlined_call_operand.hbm [shape: f32[16,32], index: 2, kind: input, shape index: {}]   ;;  %s664_s3 = inlined_call_operand.hbm [shape: f32[16,32], index: 3, kind: output, shape index: {}]  }
   0x1   :  { %8 = sst [smem:[#allocation2]] %s661_s0 }
   0x2   :  { %9 = sst [smem:[#allocation3]] %s662_s1 }
   0x3   :  { %10 = vsyncpa [#allocation5], 0 }
   0x4   :  { %12 = vsyncpa [#allocation5 + $0x1], 0 }
   0x5   :  { %13 = vsyncpa [#allocation6], 0 }
   0x6   :  { %15 = vsyncpa [#allocation6 + $0x1], 0  ;;  %s493_s16 = smov 0   ;;  %s495_s17 = smov 0  }
   0x7   :  { %s497_s18 = smov 0   ;;  %s499_s19 = smov 0  }
   0x8 LB: > { %s514_s0 = sadd.s32 4294967295, %s463_s19   ;;  %s305_s1 = sadd.s32 4294967294, %s463_s19   ;;  %s463_s19 = sphi %s499_s19, %s679_s19   ;;  %s459_s18 = sphi %s497_s18, %s678_s18   ;;  %s455_s17 = sphi %s495_s17, %s677_s17   ;;  %s451_s16 = sphi %s493_s16, %s676_s16  }
   0x9   : > { %s518_s20 = sadd.s32 1, %s463_s19   ;;  %s70_s21 = sadd.s32 1, %s459_s18 }
   0xa   : > { %s67_s22 = ssub.s32 %s463_s19, %s518_s20  ;;  %p77_p0 = scmp.ne.s32.totalorder %s459_s18, %s455_s17 }
   0xb   : > { %p68_p1 = scmp.eq.s32.totalorder %s67_s22, 0  ;;  %p78_p2 = scmp.eq.s32.totalorder %s463_s19, 0 }
   0xc   : > { %p83_p3 = scmp.ne.s32.totalorder %s455_s17, %s451_s16  ;;  %p84_p4 = scmp.eq.s32.totalorder %s514_s0, 0 }
   0xd   : > { %s530_s23 = scalar_select %p68_p1, %s459_s18, %s70_s21  }
   0xe   : > { %p532_p5 = por %p78_p2, %p77_p0  ;;  %p536_p6 = por %p84_p4, %p83_p3 }
   0xf   : > { %p107_p7 = scmp.eq.s32.totalorder %s514_s0, 1  ;;  %p113_p8 = scmp.eq.s32.totalorder %s305_s1, 1 }
  0x10   : > { %p329_p10 = scmp.lt.s32.totalorder %s463_s19, 2  ;;  %s139_s28 = sand.u32 1, %s459_s18  }
  0x11   : > { %p543_p11 = por %p107_p7, %p77_p0  ;;  %p547_p12 = por %p113_p8, %p83_p3 }
  0x12   : > { %s309_s29 = sshll.u32 %s463_s19, 7  ;;  %s308_s30 = sshll.u32 %s139_s28, 3 }
  0x13   : > { %s668_s26 = scalar_select %p543_p11, 1, 0 }
  0x14   : > { %s669_s27 = scalar_select %p547_p12, 1, 0 }
  0x15   : > { %s556_s6 = scalar_lea.hbm %s663_s2, %s309_s29  ;;  %s143_s7 = scalar_lea.vmem [#allocation4], %s308_s30 }
  0x16   : > { %s150_s8 = sshll.u32 %s143_s7, 4  ;;  %p560_p13 = pnand %p329_p10, %p532_p5  ;;  %s564_s8 = int_to_ptr.vmem [resolvable:$true] %s150_s8 }
  0x17   : > { %s140_s10 = scalar_lea.sflag [#allocation5], %s139_s28  ;;  %s367_s11 = scalar_lea.hbm %s556_s6, 128 }
  0x18   : > { %p368_p2 = scmp.ne.s32.totalorder %s556_s6, %s367_s11  ;;  %p369_p3 = pneg %p560_p13 }
  0x19   : > { %s372_s14 = scalar_lea.hbm %s663_s2, 256  ;;  %p373_p5 = scmp.lt.u32.totalorder %s556_s6, %s663_s2 }
  0x1a   : > { %p370_p4 = pnand %p369_p3, %p368_p2  ;;  %p374_p8 = scmp.lt.u32.totalorder %s372_s14, %s367_s11 }
  0x1b   : > { %p376_p9 = scmp.lt.u32.totalorder %s367_s11, %s556_s6 }
  0x1c   : > { %p371_p7 = pneg %p370_p4  ;;  %p375_p10 = por %p374_p8, %p373_p5 }
  0x1e   : > { %p377_p0 = por %p376_p9, %p375_p10 }
  0x20   : > { %p378_p1 = pnand %p377_p0, %p371_p7 }
  0x22   : > { %381 = shalt.err (!%p378_p1)
}
  0x23   : > { %s382_s21 = scalar_lea.vmem %s564_s8, 128  ;;  %s465_s22 = smov [#allocation4]  }
  0x24   : > { %p383_p2 = scmp.ne.s32.totalorder %s564_s8, %s382_s21  ;;  %s387_s24 = sshll.u32 %s465_s22, 4  ;;  %s388_s24 = int_to_ptr.vmem [resolvable:$false] %s387_s24 }
  0x25   : > { %s389_s28 = scalar_lea.vmem %s388_s24, 256  ;;  %p390_p11 = scmp.lt.s32.totalorder %s564_s8, %s388_s24 }
  0x26   : > { %p385_p4 = pnand %p383_p2, %p369_p3  ;;  %p391_p5 = scmp.lt.s32.totalorder %s389_s28, %s382_s21 }
  0x28   : > { %p386_p12 = pneg %p385_p4  ;;  %p392_p8 = por %p391_p5, %p390_p11 }
  0x2a   : > { %p393_p9 = pnand %p392_p8, %p386_p12 }
  0x2c   : > { %396 = shalt.err (!%p393_p9)
}
  0x2d   : > { %324 = dma.hbm_to_vmem [thread:$0]  (!%p560_p13), %s556_s6, 128, %s564_s8, %s140_s10  }
  0x2e   : > { %p671_p0 = scmp.lt.s32.totalorder %s463_s19, 3  ;;  %p672_p1 = scmp.ge.s32.totalorder %s463_s19, 1 }
  0x30   : > { %p156_p3 = pnand %p672_p1, %p671_p0 }
  0x31   : > { %s598_s29 = sand.u32 (!%p156_p3), 1, %s455_s17  }
  0x32   : > { %159 = sbr.rel (%p156_p3) target bundleno = 262 (0x106), region = 32  ;;  %s311_s30 = sshll.u32 (!%p156_p3), %s598_s29, 3 }
  0x33   : > { %s162_s4 = scalar_lea.sflag (!%p156_p3), [#allocation5], %s598_s29  ;;  %s165_s5 = scalar_lea.vmem (!%p156_p3), [#allocation4], %s311_s30 }
  0x39   : > { %442 = dma.done.wait (%p536_p6), %s162_s4, 128  }
  0x3a   : > { %444 = vsyncadd (%p536_p6), %s162_s4, 4294967168  ;;  %vm189_vm0 = vcmask 261120   ;;  %v188_v0 = vld [vmem:[%s165_s5] sm:$0xff]  ;;  %s211_s25 = sld [smem:[#allocation2]]  ;;  %s314_s7 = sshll.u32 %s514_s0, 7 }
  0x3b   : > { %v190_v1 = vsel %vm189_vm0, %v188_v0, 0.0  ;;  %v193_v2 = vmul.f32 %v188_v0, %v188_v0  ;;  %s212_s6 = sld [smem:[#allocation3]]  ;;  %s187_s8 = scalar_lea.vmem [#allocation7], %s311_s30 }
  0x3c   : > { %191 = vadd.xlane.f32.xlu0 %v190_v1  ;;  %s235_s9 = sshll.u32 %s187_s8, 4  ;;  %s616_s12 = scalar_lea.hbm %s664_s3, %s314_s7  ;;  %s618_s9 = int_to_ptr.vmem [resolvable:$true] %s235_s9 }
  0x3d   : > { %v194_v3 = vsel %vm189_vm0, %v193_v2, 0.0  ;;  %s222_s13 = scalar_lea.sflag [#allocation6], %s598_s29  ;;  %s397_s0 = scalar_lea.vmem %s618_s9, 128 }
  0x3e   : > { %p398_p6 = scmp.ne.s32.totalorder %s618_s9, %s397_s0  ;;  %p673_p11 = scmp.ne.s32.totalorder %s668_s26, 0 }
  0x3f   : > { %s466_s14 = smov [#allocation7]  }
  0x40   : > { %195 = vadd.xlane.f32.xlu0 %v194_v3  ;;  %v213_v17 = vstv %s211_s25  ;;  %p399_p12 = pnand %p398_p6, %p673_p11  ;;  %s401_s15 = sshll.u32 %s466_s14, 4  ;;  %s402_s15 = int_to_ptr.vmem [resolvable:$false] %s401_s15 }
  0x41   : > { %v216_v20 = vstv %s212_s6  ;;  %s403_s1 = scalar_lea.vmem %s402_s15, 256  ;;  %p404_p7 = scmp.lt.s32.totalorder %s618_s9, %s402_s15 }
  0x42   : > { %p400_p13 = pneg %p399_p12  ;;  %p405_p10 = scmp.lt.s32.totalorder %s403_s1, %s397_s0 }
  0x44   : > { %p406_p2 = por %p405_p10, %p404_p7 }
  0x46   : > { %p407_p4 = pnand %p406_p2, %p400_p13 }
  0xc9   : > { %v192_v4 = vpop.xlane.xlu0 %191 }
  0xca   : > { %v197_v5 = vmul.f32 0.03125, %v192_v4 }
  0xcc   : > { %v198_v6 = vmul.f32 %v197_v5, %v192_v4 }
  0xcd   : > { %v196_v7 = vpop.xlane.xlu0 %195 }
  0xce   : > { %v199_v8 = vsub.f32 %v196_v7, %v198_v6 }
  0xd0   : > { %v200_v9 = vmax.f32 %v199_v8, 0.0 }
  0xd2   : > { %v201_v10 = vmul.f32 0.032258064, %v200_v9 }
  0xd4   : > { %363 = vrsqrt.f32 %v201_v10  ;;  %vm204_vm1 = vcmp.eq.f32.partialorder %v201_v10, inf  ;;  %v207_v13 = vand.u32 2147483648, %v201_v10  ;;  %vm206_vm2 = vcmp.eq.f32.partialorder %v201_v10, 0.0 }
  0xde   : > { %v364_v11 = vpop.eup %363 }
  0xdf   : > { %v203_v12 = vmul.f32 %v364_v11, %v201_v10 }
  0xe1   : > { %v205_v14 = vsel %vm204_vm1, %v201_v10, %v203_v12 }
  0xe2   : > { %v208_v15 = vsel %vm206_vm2, %v207_v13, %v205_v14 }
  0xe3   : > { %v209_v16 = vadd.f32 1e-06, %v208_v15 }
  0xe5   : > { %365 = vrcp.f32 %v209_v16 }
  0xef   : > { %v366_v18 = vpop.eup %365 }
  0xf0   : > { %v214_v19 = vmul.f32 %v366_v18, %v213_v17 }
  0xf2   : > { %v215_v21 = vmul.f32 %v214_v19, %v197_v5  ;;  %v218_v23 = vmul.f32 %v214_v19, %v188_v0 }
  0xf4   : > { %v217_v22 = vsub.f32 %v216_v20, %v215_v21 }
  0xf6   : > { %v219_v24 = vadd.f32 %v218_v23, %v217_v22 }
  0xf8   : > { %220 = vst.msk [vmem:[%s187_s8] sm:$0xff] %vm189_vm0, %v219_v24 }
  0xf9   : > { %410 = shalt.err (!%p407_p4)
}
  0xfa   : > { %s411_s21 = scalar_lea.hbm %s616_s12, 128  ;;  %s415_s28 = scalar_lea.hbm %s664_s3, 256 }
  0xfb   : > { %p412_p5 = scmp.ne.s32.totalorder %s616_s12, %s411_s21  ;;  %p416_p0 = scmp.lt.u32.totalorder %s616_s12, %s664_s3 }
  0xfc   : > { %p417_p1 = scmp.lt.u32.totalorder %s415_s28, %s411_s21  ;;  %p419_p6 = scmp.lt.u32.totalorder %s411_s21, %s616_s12 }
  0xfd   : > { %p413_p8 = pnand %p412_p5, %p673_p11 }
  0xfe   : > { %p418_p3 = por %p417_p1, %p416_p0 }
  0xff   : > { %p414_p9 = pneg %p413_p8 }
 0x100   : > { %p420_p12 = por %p419_p6, %p418_p3 }
 0x102   : > { %p421_p13 = pnand %p420_p12, %p414_p9 }
 0x104   : > { %424 = shalt.err (!%p421_p13)
}
 0x105   : > { %319 = dma.vmem_to_hbm [thread:$0]  (%p673_p11), %s618_s9, 128, %s616_s12, %s222_s13  }
 0x106 PF: > { %s247_s4 = sand.u32 1, %s451_s16   ;;  %p674_p7 = scmp.ne.s32.totalorder %s669_s27, 0 }
 0x107   : > { %p675_p10 = scmp.ge.s32.totalorder %s463_s19, 2  ;;  %s248_s5 = scalar_lea.sflag [#allocation6], %s247_s4 }
 0x109   : > { %p326_p2 = pnand %p675_p10, %p674_p7 }
 0x10b   : > { %446 = dma.done.wait (!%p326_p2), %s248_s5, 128  }
 0x10c   : > { %448 = vsyncadd (!%p326_p2), %s248_s5, 4294967168  ;;  %p18_p4 = scmp.ge.s32.totalorder %s518_s20, 4   ;;  %s676_s16 = smov %s455_s17 }
 0x10d   : > { %s677_s17 = smov %s459_s18  ;;  %s678_s18 = smov %s530_s23 }
 0x10e   : > { %s679_s19 = smov %s518_s20  ;;  %20 = sbr.rel (!%p18_p4) target bundleno = 8 (0x8), region = 77 }
 0x115   :  { %253 = vsyncpa [#allocation5], 1 }
 0x116   :  { %255 = vsyncpa [#allocation5 + $0x1], 1 }
 0x117   :  { %256 = vsyncpa [#allocation6], 1 }
 0x118   :  { %258 = vsyncpa [#allocation6 + $0x1], 1 }

</bundles_post_ra>
